<compile_context>
chip_gen: v5e
topology: v5e:2x2
jax: 0.10.0
libtpu: 0.0.40
codegen_flags: <defaults>
</compile_context>

<pallas_src>
import numpy as np
import jax
import jax.numpy as jnp
from jax.experimental import pallas as pl
from jax.experimental.pallas import tpu as pltpu

# ---------------- synthetic config (mirrors SimpleSDF.__init__) ----------------
HIDDEN = 32
IN_DIM = 3
N_LEVELS = 4              # hash-grid levels (small, synthetic)
LEVEL_DIM = 2             # features per level
LOG2_HASHMAP_SIZE = 8     # cfg['grid']['hash_size'] (small, synthetic)
BASE_RES = 4
N_BINS = 4                # cfg['pos']['n_bins'] for OneBlob
VOXEL_SIZE = 0.05         # cfg['grid']['voxel_size']
USE_ONEBLOB = True
USE_COLOR = True
USE_ROT_SCALE = True

BOUNDING_BOX = np.array([[-1.0, 1.0], [-1.0, 1.0], [-1.0, 1.0]], dtype=np.float32)
DIM_MAX = float((BOUNDING_BOX[:, 1] - BOUNDING_BOX[:, 0]).max())
SIGMOID_ALPHA = 5.0 / DIM_MAX
RESOLUTION = int(DIM_MAX / VOXEL_SIZE)          # desired_resolution for the grid

GRID_DIM = N_LEVELS * LEVEL_DIM                 # 8
PE_DIM = IN_DIM * N_BINS                        # 12
FEAT_DIM = PE_DIM + GRID_DIM                    # 20 (feat order = [oneblob | hashgrid])

# Fused decoder output slab: two sublane-aligned 8-row groups (padded to 16 rows).
OUT_ROWS = 16
ROW_OPA, ROW_SCL, ROW_COL, ROW_ROT, ROW_SDF = 0, 1, 4, 8, 12

TARGET_TM = 16384          # points per grid step (lane axis), BW-roofline sized

# ---------------- encoders (plain-JAX glue; gather / erf heavy) ----------------
_PRIMES = jnp.array([1, 2654435761, 805459861], dtype=jnp.uint32)


def hash_grid_encode_fm(p, table):
    """Hash-grid encoding, emitted feature-major: p [N, 3] -> [GRID_DIM, N]."""
    # TODO(synk): tcnn HashGrid uses direct (non-hashed) indexing for coarse dense
    # levels and fp16 tables; here every level uses the spatial hash, in f32.
    n = p.shape[0]
    t = 1 << LOG2_HASHMAP_SIZE
    per_level_scale = np.exp2(np.log2(RESOLUTION / BASE_RES) / (N_LEVELS - 1))
    feats = []
    for l in range(N_LEVELS):
        res = int(np.floor(BASE_RES * per_level_scale ** l))
        xs = p * res
        x0f = jnp.floor(xs)
        w = xs - x0f
        x0 = x0f.astype(jnp.int32)
        tab_t = table[l].T                               # [LEVEL_DIM, t]
        acc = jnp.zeros((LEVEL_DIM, n), jnp.float32)
        for corner in range(8):
            offs = np.array([(corner >> d) & 1 for d in range(3)], dtype=np.int32)
            c = (x0 + offs[None, :]).astype(jnp.uint32)
            h = (c[:, 0] * _PRIMES[0]) ^ (c[:, 1] * _PRIMES[1]) ^ (c[:, 2] * _PRIMES[2])
            idx = (h % jnp.uint32(t)).astype(jnp.int32)
            wt = jnp.prod(jnp.where(offs[None, :] == 1, w, 1.0 - w), axis=-1)   # [N]
            acc = acc + wt[None, :] * jnp.take(tab_t, idx, axis=1)              # [2, N]
        feats.append(acc)
    return jnp.concatenate(feats, axis=0)                # [GRID_DIM, N]


def one_blob_encode_fm(p):
    """OneBlob encoding, emitted feature-major: p [N, 3] -> [PE_DIM, N]."""
    # TODO(synk): tcnn OneBlob uses a quartic-kernel approximation; this is the exact
    # Gaussian-CDF OneBlob from Neural Importance Sampling.
    sigma = 1.0 / N_BINS
    edges = jnp.arange(N_BINS + 1, dtype=jnp.float32) / N_BINS
    p_t = p.T                                                    # [3, N]
    z = (edges[None, :, None] - p_t[:, None, :]) / (sigma * np.sqrt(2.0))
    cdf = 0.5 * (1.0 + jax.scipy.special.erf(z))                 # [3, n_bins+1, N]
    f = cdf[:, 1:, :] - cdf[:, :-1, :]                           # [3, n_bins, N]
    return f.reshape(PE_DIM, p.shape[0])                         # [PE_DIM, N]


# ------------------------- decoder weight pre-fusion ----------------------------
def fuse_decoder_weights(pr):
    """Collapse the whole (purely linear) decoder stack into one matmul's weights.

    Every decoder MLP is a single nn.Linear with no activation in between, so each
    head composes linearly with the hidden layer:
        head(feat) = (W_head^T W_sdfh^T) feat + (W_head^T b_sdfh + b_head)
    Returns feature-major weights split per kernel input:
        w_pe [16, 12], w_gr [16, 8], w_dir [16, 3], bias [16, 1]
    using the OUT_ROWS layout: rows 0:8 = [opa|scale|color|pad] (sigmoid group),
    rows 8:16 = [rot|sdf|pad].  All head biases are folded into `bias`.
    """
    w_h = pr['w_sdfh']              # [FEAT_DIM, HIDDEN]
    b_h = pr['b_sdfh'][0]           # [HIDDEN]

    def head(w_a, b_a):             # w_a [HIDDEN, k], b_a [1, k]
        return w_h @ w_a, b_h @ w_a + b_a[0]

    w_opa, b_opa = head(pr['w_opa'], pr['b_opa'])
    w_scl, b_scl = head(pr['w_scl'], pr['b_scl'])
    w_rot, b_rot = head(pr['w_rot'], pr['b_rot'])
    w_col, b_col = head(pr['w_colh'], pr['b_col'])

    wf = jnp.zeros((OUT_ROWS, FEAT_DIM), jnp.float32)
    wf = wf.at[ROW_OPA].set(w_opa[:, 0])
    wf = wf.at[ROW_SCL:ROW_SCL + 3].set(w_scl.T)
    wf = wf.at[ROW_COL:ROW_COL + 3].set(w_col.T)
    wf = wf.at[ROW_ROT:ROW_ROT + 4].set(w_rot.T)
    wf = wf.at[ROW_SDF].set(pr['w_sdf1'][:, 0])

    wd = jnp.zeros((OUT_ROWS, IN_DIM), jnp.float32)
    wd = wd.at[ROW_COL:ROW_COL + 3].set(pr['w_cold'].T)

    b = jnp.zeros((OUT_ROWS,), jnp.float32)
    b = b.at[ROW_OPA].set(b_opa[0])
    b = b.at[ROW_SCL:ROW_SCL + 3].set(b_scl)
    b = b.at[ROW_COL:ROW_COL + 3].set(b_col)
    b = b.at[ROW_ROT:ROW_ROT + 4].set(b_rot)
    b = b.at[ROW_SDF].set(pr['b_sdf1'][0, 0])

    return wf[:, :PE_DIM], wf[:, PE_DIM:], wd, b.reshape(OUT_ROWS, 1)


# ---------------------------- Pallas decoder kernel ----------------------------
def _make_sdf_kernel(voxel_size):
    scale_gain = float(voxel_size) * 10.0

    def kernel(pe_ref, gr_ref, dir_ref, wpe_ref, wgr_ref, wdir_ref, b_ref, out_ref):
        # Single fused linear stage: every head lands in one [16, tm] slab.
        pre = (jnp.dot(wpe_ref[...], pe_ref[...], preferred_element_type=jnp.float32)
               + jnp.dot(wgr_ref[...], gr_ref[...], preferred_element_type=jnp.float32)
               + jnp.dot(wdir_ref[...], dir_ref[...], preferred_element_type=jnp.float32)
               + b_ref[...])                                       # [16, tm]
        tm = pre.shape[1]
        row = jax.lax.broadcasted_iota(jnp.int32, (8, tm), 0)

        # Group 0 (sublanes 0:8): one grouped sigmoid covers opacity|scale|color;
        # the scale head's voxel_size*10 gain is one per-row select.
        g0 = jax.nn.sigmoid(pre[0:8, :])
        g0 = jnp.where((row >= ROW_SCL) & (row < ROW_SCL + 3), g0 * scale_gain, g0)
        out_ref[0:8, :] = g0                                       # aligned 8-row store

        # Group 1 (sublanes 8:16): L2-normalize rot rows, pass sdf through.
        g1 = pre[8:16, :]
        rot = g1[0:4, :]
        # F.normalize(p=2, dim=-1, eps=1e-12) == rot * rsqrt(max(|rot|^2, eps^2))
        inv = jax.lax.rsqrt(jnp.maximum(jnp.sum(rot * rot, axis=0, keepdims=True),
                                        1e-24))
        out_ref[8:16, :] = g1 * jnp.where(row < 4, inv, 1.0)       # aligned 8-row store

    return kernel


def _cdiv(a, b):
    return -(-a // b)


def _choose_tile(n):
    # BW-roofline sized tile (16384 pts/step keeps double-buffered VMEM ~5-6 MB,
    # inside v5e/v6e/v7x default scoped limits).  Only shrink to keep >= 2 grid
    # steps so ("parallel",) can shard across v7x's two TensorCores; floor 128.
    tm = TARGET_TM
    while tm > 128 and _cdiv(n, tm) < 2:
        tm //= 2
    return tm


def decode_pallas(pe, gr, dir_t, w_pe, w_gr, w_dir, bias, *, voxel_size=VOXEL_SIZE):
    n = pe.shape[1]
    tm = _choose_tile(n)
    steps = _cdiv(n, tm)       # ragged tail = masked last tile; no jnp.pad copies

    cost = pl.CostEstimate(
        flops=2 * OUT_ROWS * (PE_DIM + GRID_DIM + IN_DIM) * n,
        transcendentals=9 * n,                                     # 8 sigmoid rows + rsqrt
        bytes_accessed=4 * n * (PE_DIM + GRID_DIM + IN_DIM + OUT_ROWS))

    out = pl.pallas_call(
        _make_sdf_kernel(voxel_size),
        out_shape=jax.ShapeDtypeStruct((OUT_ROWS, n), jnp.float32),
        grid_spec=pltpu.PrefetchScalarGridSpec(
            num_scalar_prefetch=0,
            grid=(steps,),
            in_specs=[pl.BlockSpec((PE_DIM, tm), lambda i: (0, i)),
                      pl.BlockSpec((GRID_DIM, tm), lambda i: (0, i)),
                      pl.BlockSpec((IN_DIM, tm), lambda i: (0, i)),
                      pl.BlockSpec((OUT_ROWS, PE_DIM), lambda i: (0, 0)),
                      pl.BlockSpec((OUT_ROWS, GRID_DIM), lambda i: (0, 0)),
                      pl.BlockSpec((OUT_ROWS, IN_DIM), lambda i: (0, 0)),
                      pl.BlockSpec((OUT_ROWS, 1), lambda i: (0, 0))],
            out_specs=pl.BlockSpec((OUT_ROWS, tm), lambda i: (0, i)),
        ),
        compiler_params=pltpu.CompilerParams(
            dimension_semantics=("parallel",)),
        cost_estimate=cost,
    )(pe, gr, dir_t, w_pe, w_gr, w_dir, bias)

    # TODO(synk): this [16, N] -> [N, 16] transpose is one extra HBM round trip of
    # the output slab; kept so the kernel's stores stay lane-dense (the bigger lever).
    out_t = out.T
    return (out_t[:, ROW_SDF:ROW_SDF + 1],
            out_t[:, ROW_OPA:ROW_OPA + 1],
            out_t[:, ROW_SCL:ROW_SCL + 3],
            out_t[:, ROW_ROT:ROW_ROT + 4],
            out_t[:, ROW_COL:ROW_COL + 3])


# ---------------------------- full forward (wrapper) ---------------------------
def simple_sdf_forward(x, dirs, params):
    # TODO(synk): the hash-grid gather / OneBlob erf encoders stay in plain JAX;
    # moving the 8 KB table into VMEM and gathering in-kernel would remove the
    # feat HBM round-trip but needs an in-kernel gather.
    p = jax.nn.sigmoid(SIGMOID_ALPHA * x)                 # self.normalization(x)
    pe = one_blob_encode_fm(p)                            # [12, N] feature-major
    gr = hash_grid_encode_fm(p, params['table'])          # [8, N]  feature-major
    w_pe, w_gr, w_dir, bias = fuse_decoder_weights(params)
    sdf, opa, scl, rot, col = decode_pallas(pe, gr, dirs.T, w_pe, w_gr, w_dir, bias)
    return {'sdf': sdf, 'opacity': opa, 'scale': scl, 'rot': rot, 'color': col}


def reference_forward(x, dirs, pr):
    p = jax.nn.sigmoid(SIGMOID_ALPHA * x)
    feat = jnp.concatenate([one_blob_encode_fm(p).T,
                            hash_grid_encode_fm(p, pr['table']).T], axis=-1)
    sdf = feat @ pr['w_sdf1'] + pr['b_sdf1']
    h = feat @ pr['w_sdfh'] + pr['b_sdfh']
    opa = jax.nn.sigmoid(h @ pr['w_opa'] + pr['b_opa'])
    scl = jax.nn.sigmoid(h @ pr['w_scl'] + pr['b_scl']) * (VOXEL_SIZE * 10.0)
    rot = h @ pr['w_rot'] + pr['b_rot']
    rot = rot / jnp.maximum(jnp.linalg.norm(rot, axis=-1, keepdims=True), 1e-12)
    col = jax.nn.sigmoid(h @ pr['w_colh'] + dirs @ pr['w_cold'] + pr['b_col'])
    return {'sdf': sdf, 'opacity': opa, 'scale': scl, 'rot': rot, 'color': col}


# ------------------------------ param construction -----------------------------
def linear_params(key, in_dim, out_dim):
    k1, k2 = jax.random.split(key)
    bound = 1.0 / np.sqrt(in_dim)
    w = jax.random.uniform(k1, (in_dim, out_dim), jnp.float32, -bound, bound)
    b = jax.random.uniform(k2, (1, out_dim), jnp.float32, -bound, bound)
    return w, b


def init_params(key):
    ks = jax.random.split(key, 7)
    t = 1 << LOG2_HASHMAP_SIZE
    table = jax.random.uniform(ks[0], (N_LEVELS, t, LEVEL_DIM), jnp.float32,
                               -1e-4, 1e-4)
    # sdf_decoder: Linear(FEAT_DIM, HIDDEN + 1), split into sdf column / hidden cols
    w_sdf, b_sdf = linear_params(ks[1], FEAT_DIM, HIDDEN + 1)
    w_opa, b_opa = linear_params(ks[2], HIDDEN, 1)
    w_scl, b_scl = linear_params(ks[3], HIDDEN, 3)
    w_rot, b_rot = linear_params(ks[4], HIDDEN, 4)
    # color_decoder: Linear(HIDDEN + 3, 3), split into hidden part / dir part
    w_col, b_col = linear_params(ks[5], HIDDEN + 3, 3)
    return {
        'table': table,
        'w_sdf1': w_sdf[:, :1], 'b_sdf1': b_sdf[:, :1],
        'w_sdfh': w_sdf[:, 1:], 'b_sdfh': b_sdf[:, 1:],
        'w_opa': w_opa, 'b_opa': b_opa,
        'w_scl': w_scl, 'b_scl': b_scl,
        'w_rot': w_rot, 'b_rot': b_rot,
        'w_colh': w_col[:HIDDEN, :], 'w_cold': w_col[HIDDEN:, :], 'b_col': b_col,
    }


# ------------------------------------ main --------------------------------------
if __name__ == "__main__":
    key = jax.random.PRNGKey(0)
    kp, kx, kd = jax.random.split(key, 3)
    params = init_params(kp)

    # N deliberately NOT a multiple of the tile: exercises the masked-last-tile
    # path and still gives a 2-step grid (tile shrinks to 128 at this small N;
    # large N uses 16384-point tiles).
    N = 200
    x = jax.random.uniform(kx, (N, IN_DIM), jnp.float32, -1.0, 1.0)
    dirs = jax.random.normal(kd, (N, IN_DIM), jnp.float32)
    dirs = dirs / jnp.linalg.norm(dirs, axis=-1, keepdims=True)

    fwd = jax.jit(simple_sdf_forward)
    out = fwd(x, dirs, params)
    jax.block_until_ready(out)

    ref = reference_forward(x, dirs, params)
    for name in ('sdf', 'opacity', 'scale', 'rot', 'color'):
        np.testing.assert_allclose(np.asarray(out[name]), np.asarray(ref[name]),
                                   rtol=1e-3, atol=1e-3)

    print("KERNEL_OK")
</pallas_src>

<mosaic_0001>
module attributes {stable_mosaic.version = 11 : i64} {
  func.func @kernel(%arg0: i32, %arg1: memref<12x128xf32, #tpu.memory_space<vmem>>, %arg2: memref<8x128xf32, #tpu.memory_space<vmem>>, %arg3: memref<3x128xf32, #tpu.memory_space<vmem>>, %arg4: memref<16x12xf32, #tpu.memory_space<vmem>>, %arg5: memref<16x8xf32, #tpu.memory_space<vmem>>, %arg6: memref<16x3xf32, #tpu.memory_space<vmem>>, %arg7: memref<16x1xf32, #tpu.memory_space<vmem>>, %arg8: memref<16x128xf32, #tpu.memory_space<vmem>>) attributes {dimension_semantics = [#tpu.dimension_semantics<parallel>], iteration_bounds = array<i64: 2>, scalar_prefetch = 0 : i64, scratch_operands = 0 : i64, tpu.core_type = #tpu.core_type<tc>, window_params = [{transform_indices = @transform_0, window_bounds = array<i64: 12, 128>}, {transform_indices = @transform_1, window_bounds = array<i64: 8, 128>}, {transform_indices = @transform_2, window_bounds = array<i64: 3, 128>}, {pipeline_mode = #tpu.pipeline_mode<synchronous>, transform_indices = @transform_3, window_bounds = array<i64: 16, 12>}, {pipeline_mode = #tpu.pipeline_mode<synchronous>, transform_indices = @transform_4, window_bounds = array<i64: 16, 8>}, {pipeline_mode = #tpu.pipeline_mode<synchronous>, transform_indices = @transform_5, window_bounds = array<i64: 16, 3>}, {pipeline_mode = #tpu.pipeline_mode<synchronous>, transform_indices = @transform_6, window_bounds = array<i64: 16, 1>}, {transform_indices = @transform_7, window_bounds = array<i64: 16, 128>}]} {
    %c0 = arith.constant 0 : index
    %c0_0 = arith.constant 0 : index
    %0 = vector.load %arg4[%c0, %c0_0] : memref<16x12xf32, #tpu.memory_space<vmem>>, vector<16x12xf32>
    %c0_1 = arith.constant 0 : index
    %c0_2 = arith.constant 0 : index
    %1 = vector.load %arg1[%c0_1, %c0_2] : memref<12x128xf32, #tpu.memory_space<vmem>>, vector<12x128xf32>
    %cst = arith.constant dense<0.000000e+00> : vector<16x128xf32>
    %2 = tpu.matmul %0, %1, %cst {dimension_numbers = #tpu.dot_dimension_numbers<[1], [0], [0], [1], [0, 0, 1, 1], [], []>} : vector<16x12xf32>, vector<12x128xf32>, vector<16x128xf32> -> vector<16x128xf32>
    %c0_3 = arith.constant 0 : index
    %c0_4 = arith.constant 0 : index
    %3 = vector.load %arg5[%c0_3, %c0_4] : memref<16x8xf32, #tpu.memory_space<vmem>>, vector<16x8xf32>
    %c0_5 = arith.constant 0 : index
    %c0_6 = arith.constant 0 : index
    %4 = vector.load %arg2[%c0_5, %c0_6] : memref<8x128xf32, #tpu.memory_space<vmem>>, vector<8x128xf32>
    %cst_7 = arith.constant dense<0.000000e+00> : vector<16x128xf32>
    %5 = tpu.matmul %3, %4, %cst_7 {dimension_numbers = #tpu.dot_dimension_numbers<[1], [0], [0], [1], [0, 0, 1, 1], [], []>} : vector<16x8xf32>, vector<8x128xf32>, vector<16x128xf32> -> vector<16x128xf32>
    %6 = arith.addf %2, %5 : vector<16x128xf32>
    %c0_8 = arith.constant 0 : index
    %c0_9 = arith.constant 0 : index
    %7 = vector.load %arg6[%c0_8, %c0_9] : memref<16x3xf32, #tpu.memory_space<vmem>>, vector<16x3xf32>
    %c0_10 = arith.constant 0 : index
    %c0_11 = arith.constant 0 : index
    %8 = vector.load %arg3[%c0_10, %c0_11] : memref<3x128xf32, #tpu.memory_space<vmem>>, vector<3x128xf32>
    %cst_12 = arith.constant dense<0.000000e+00> : vector<16x128xf32>
    %9 = tpu.matmul %7, %8, %cst_12 {dimension_numbers = #tpu.dot_dimension_numbers<[1], [0], [0], [1], [0, 0, 1, 1], [], []>} : vector<16x3xf32>, vector<3x128xf32>, vector<16x128xf32> -> vector<16x128xf32>
    %10 = arith.addf %6, %9 : vector<16x128xf32>
    %c0_13 = arith.constant 0 : index
    %c0_14 = arith.constant 0 : index
    %11 = vector.load %arg7[%c0_13, %c0_14] : memref<16x1xf32, #tpu.memory_space<vmem>>, vector<16x1xf32>
    %12 = vector.broadcast %11 : vector<16x1xf32> to vector<16x128xf32>
    %13 = arith.addf %10, %12 : vector<16x128xf32>
    %14 = tpu.iota {dimensions = array<i32: 0>} : vector<8x128xi32>
    %15 = vector.extract_strided_slice %13 {offsets = [0, 0], sizes = [8, 128], strides = [1, 1]} : vector<16x128xf32> to vector<8x128xf32>
    %16 = arith.negf %15 : vector<8x128xf32>
    %17 = math.exp %16 : vector<8x128xf32>
    %cst_15 = arith.constant 1.000000e+00 : f32
    %18 = vector.broadcast %cst_15 : f32 to vector<8x128xf32>
    %19 = arith.addf %18, %17 : vector<8x128xf32>
    %20 = arith.divf %18, %19 : vector<8x128xf32>
    %c1_i32 = arith.constant 1 : i32
    %21 = vector.broadcast %c1_i32 : i32 to vector<8x128xi32>
    %22 = arith.cmpi sge, %14, %21 : vector<8x128xi32>
    %c4_i32 = arith.constant 4 : i32
    %23 = vector.broadcast %c4_i32 : i32 to vector<8x128xi32>
    %24 = arith.cmpi slt, %14, %23 : vector<8x128xi32>
    %25 = arith.andi %22, %24 : vector<8x128xi1>
    %cst_16 = arith.constant 5.000000e-01 : f32
    %26 = vector.broadcast %cst_16 : f32 to vector<8x128xf32>
    %27 = arith.mulf %20, %26 : vector<8x128xf32>
    %28 = arith.select %25, %27, %20 : vector<8x128xi1>, vector<8x128xf32>
    %c0_17 = arith.constant 0 : index
    %c0_18 = arith.constant 0 : index
    %29 = vector.load %arg8[%c0_17, %c0_18] : memref<16x128xf32, #tpu.memory_space<vmem>>, vector<8x128xf32>
    tpu.vector_store %arg8[%c0_17, %c0_18], %28 {strides = array<i32>} : memref<16x128xf32, #tpu.memory_space<vmem>>, vector<8x128xf32>,
    %30 = vector.extract_strided_slice %13 {offsets = [8, 0], sizes = [8, 128], strides = [1, 1]} : vector<16x128xf32> to vector<8x128xf32>
    %31 = vector.extract_strided_slice %30 {offsets = [0, 0], sizes = [4, 128], strides = [1, 1]} : vector<8x128xf32> to vector<4x128xf32>
    %32 = arith.mulf %31, %31 : vector<4x128xf32>
    %cst_19 = arith.constant dense<0.000000e+00> : vector<128xf32>
    %33 = vector.multi_reduction <add>, %32, %cst_19 [0] : vector<4x128xf32> to vector<128xf32>
    %34 = vector.shape_cast %33 : vector<128xf32> to vector<1x128xf32>
    %cst_20 = arith.constant 1.000000e-24 : f32
    %35 = vector.broadcast %cst_20 : f32 to vector<1x128xf32>
    %36 = arith.maximumf %34, %35 : vector<1x128xf32>
    %37 = math.rsqrt %36 : vector<1x128xf32>
    %c4_i32_21 = arith.constant 4 : i32
    %38 = vector.broadcast %c4_i32_21 : i32 to vector<8x128xi32>
    %39 = arith.cmpi slt, %14, %38 : vector<8x128xi32>
    %cst_22 = arith.constant 1.000000e+00 : f32
    %40 = vector.shape_cast %37 : vector<1x128xf32> to vector<1x128xf32>
    %41 = vector.broadcast %40 : vector<1x128xf32> to vector<8x128xf32>
    %42 = vector.broadcast %cst_22 : f32 to vector<8x128xf32>
    %43 = arith.select %39, %41, %42 : vector<8x128xi1>, vector<8x128xf32>
    %44 = arith.mulf %30, %43 : vector<8x128xf32>
    %c8 = arith.constant 8 : index
    %c0_23 = arith.constant 0 : index
    %45 = vector.load %arg8[%c8, %c0_23] : memref<16x128xf32, #tpu.memory_space<vmem>>, vector<8x128xf32>
    tpu.vector_store %arg8[%c8, %c0_23], %44 {strides = array<i32>} : memref<16x128xf32, #tpu.memory_space<vmem>>, vector<8x128xf32>,
    return
  }
  func.func @transform_0(%arg0: i32) -> (i32, i32) {
    %c0_i32 = arith.constant 0 : i32
    %c0_i32_0 = arith.constant 0 : i32
    return %c0_i32, %arg0 : i32, i32
  }
  func.func @transform_1(%arg0: i32) -> (i32, i32) {
    %c0_i32 = arith.constant 0 : i32
    %c0_i32_0 = arith.constant 0 : i32
    return %c0_i32, %arg0 : i32, i32
  }
  func.func @transform_2(%arg0: i32) -> (i32, i32) {
    %c0_i32 = arith.constant 0 : i32
    %c0_i32_0 = arith.constant 0 : i32
    return %c0_i32, %arg0 : i32, i32
  }
  func.func @transform_3(%arg0: i32) -> (i32, i32) {
    %c0_i32 = arith.constant 0 : i32
    %c0_i32_0 = arith.constant 0 : i32
    %c0_i32_1 = arith.constant 0 : i32
    return %c0_i32, %c0_i32_0 : i32, i32
  }
  func.func @transform_4(%arg0: i32) -> (i32, i32) {
    %c0_i32 = arith.constant 0 : i32
    %c0_i32_0 = arith.constant 0 : i32
    %c0_i32_1 = arith.constant 0 : i32
    return %c0_i32, %c0_i32_0 : i32, i32
  }
  func.func @transform_5(%arg0: i32) -> (i32, i32) {
    %c0_i32 = arith.constant 0 : i32
    %c0_i32_0 = arith.constant 0 : i32
    %c0_i32_1 = arith.constant 0 : i32
    return %c0_i32, %c0_i32_0 : i32, i32
  }
  func.func @transform_6(%arg0: i32) -> (i32, i32) {
    %c0_i32 = arith.constant 0 : i32
    %c0_i32_0 = arith.constant 0 : i32
    %c0_i32_1 = arith.constant 0 : i32
    return %c0_i32, %c0_i32_0 : i32, i32
  }
  func.func @transform_7(%arg0: i32) -> (i32, i32) {
    %c0_i32 = arith.constant 0 : i32
    %c0_i32_0 = arith.constant 0 : i32
    return %c0_i32, %arg0 : i32, i32
  }
}

</mosaic_0001>

<bundles_post_ra>
// kernel: simple_sdf_forward.1
= control target key start
LH: loop header
LB: loop body
LE: loop exit
PB: predicated region body
PF: predicated region fallthrough
CT: control target
= control target key end

     0   :  { %s768_s24 = smov 0   ;;  %s770_s25 = smov 0   ;;  %s864_s0 = inlined_call_operand.vmem [shape: f32[12,200], index: 0, kind: input, shape index: {}]   ;;  %s865_s1 = inlined_call_operand.vmem [shape: f32[8,200], index: 1, kind: input, shape index: {}]   ;;  %s866_s2 = inlined_call_operand.vmem [shape: f32[3,200], index: 2, kind: input, shape index: {}]   ;;  %s867_s3 = inlined_call_operand.vmem [shape: f32[16,12], index: 3, kind: input, shape index: {}]   ;;  %s868_s4 = inlined_call_operand.vmem [shape: f32[16,8], index: 4, kind: input, shape index: {}]   ;;  %s869_s5 = inlined_call_operand.vmem [shape: f32[16,3], index: 5, kind: input, shape index: {}]   ;;  %s870_s6 = inlined_call_operand.vmem [shape: f32[16,1], index: 6, kind: input, shape index: {}]   ;;  %s871_s7 = inlined_call_operand.vmem [shape: f32[16,200], index: 7, kind: output, shape index: {}]  }
   0x1   :  { %s772_s26 = smov 0  }
   0x2 LB: > { %s781_s27 = sadd.s32 4294967295, %s725_s26   ;;  %s783_s28 = sadd.s32 1, %s725_s26   ;;  %s725_s26 = sphi %s772_s26, %s875_s26   ;;  %s721_s25 = sphi %s770_s25, %s874_s25   ;;  %s717_s24 = sphi %s768_s24, %s873_s24  }
   0x3   : > { %s21_s29 = ssub.s32 %s725_s26, %s783_s28  ;;  %s24_s30 = sadd.s32 1, %s721_s25 }
   0x4   : > { %p22_p0 = scmp.eq.s32.totalorder %s21_s29, 0  ;;  %p31_p1 = scmp.ne.s32.totalorder %s721_s25, %s717_s24 }
   0x5   : > { %p32_p2 = scmp.eq.s32.totalorder %s725_s26, 0  ;;  %p197_p3 = scmp.eq.s32.totalorder %s781_s27, 1 }
   0x6   : > { %s791_s8 = scalar_select %p22_p0, %s721_s25, %s24_s30  }
   0x7   : > { %p33_p4 = por %p32_p2, %p31_p1  ;;  %p793_p5 = por %p197_p3, %p31_p1 }
   0x8   : > { %p648_p6 = scmp.ge.s32.totalorder %s725_s26, 2 }
   0xa   : > { %231 = sbr.rel (%p648_p6) target bundleno = 21 (0x15), region = 32 }
   0xf   : > { %234 = sbr.rel (!%p33_p4) target bundleno = 21 (0x15), region = 36  ;;  %s236_s10 = sand.u32 (%p33_p4), 1, %s721_s25  }
  0x10   : > { %s650_s11 = sshll.u32 (%p33_p4), %s725_s26, 3  ;;  %s649_s12 = sshll.u32 (%p33_p4), %s236_s10, 4 }
  0x11   : > { %s240_s15 = scalar_lea.vmem (%p33_p4), %s864_s0, %s650_s11  ;;  %s238_s16 = scalar_lea.vmem (%p33_p4), [#allocation2], %s649_s12 }
  0x12   : > { %v271_v0 = vld [vmem:[%s240_s15] sm:$0xff] (%p33_p4)  ;;  %v273_v1 = vld [vmem:[%s240_s15 + $0x10] sm:$0xff] (%p33_p4) }
  0x13   : > { %272 = vst [vmem:[%s238_s16] sm:$0xff] (%p33_p4), %v271_v0 }
  0x14   : > { %274 = vst [vmem:[%s238_s16 + $0x8] sm:$0xff] %v273_v1 }
  0x15 PF: > { %p651_p7 = scmp.ge.s32.totalorder %s725_s26, 1  ;;  %p293_p8 = scmp.lt.s32.totalorder %s725_s26, 3 }
  0x17   : > { %p294_p9 = pnand %p651_p7, %p293_p8 }
  0x18   : > { %p338_p10 = scmp.lt.s32.totalorder (!%p294_p9), %s781_s27, 1  ;;  %s300_s17 = sand.u32 (!%p294_p9), 1, %s717_s24  }
  0x19   : > { %297 = sbr.rel (%p294_p9) target bundleno = 227 (0xe3), region = 82  ;;  %s803_s18 = sshll.u32 (!%p294_p9), %s300_s17, 4 }
  0x1a   : > { %s302_s23 = scalar_lea.vmem (!%p294_p9), [#allocation2], %s803_s18  ;;  %s337_s10 = scalar_lea.vmem (!%p294_p9), [#allocation3], %s803_s18 }
  0x1e   : > { %s339_s19 = scalar_select %p338_p10, %s781_s27, 1  ;;  %vm390_vm0 = vcmask 1043456   ;;  %v457_v2 = vld [vmem:[%s870_s6 + $0x8] sm:$0xff]  ;;  %v727_v3 = vmov 0   ;;  %vm427_vm1 = vcmask 1042432   ;;  %v417_v5 = vld [vmem:[%s869_s5] sm:$0xff]  ;;  %v470_v36 = vlaneseq }
  0x1f   : > { %696 = vset.pattern.permute.xlu0 %v727_v3  ;;  %v349_v4 = vld [vmem:[%s302_s23 + $0x8] sm:$0xf]  ;;  %vm420_vm2 = vcmask 23552   ;;  %v348_v6 = vld [vmem:[%s302_s23] sm:$0xff]  ;;  %vm353_vm3 = vcmask 64512   ;;  %vm383_vm4 = vcmask 97280  }
  0x20   : > { %s655_s22 = sshll.u32 %s339_s19, 2  ;;  %s654_s26 = sshll.u32 %s339_s19, 3  ;;  %465 = vperm.xlu0 %696, %v457_v2   ;;  %658 = vmatpush.msk.msra.mxu1 %vm390_vm0, %v349_v4  ;;  %v350_v7 = vld [vmem:[%s868_s4] sm:$0xff]  ;;  %v347_v11 = vld [vmem:[%s867_s3 + $0x8] sm:$0xff]  ;;  %v471_v41 = vshrl.u32 %v470_v36, 7 }
  0x21   : > { %s345_s24 = scalar_lea.vmem %s866_s2, %s655_s22  ;;  %s341_s14 = scalar_lea.vmem %s865_s1, %s654_s26  ;;  %669 = vmatpush.msk.msra.mxu3 %vm390_vm0, %v349_v4  ;;  %v346_v10 = vld [vmem:[%s867_s3] sm:$0xff]  ;;  %v418_v13 = vld [vmem:[%s869_s5 + $0x8] sm:$0xff] }
  0x22   : > { %v419_v8 = vld [vmem:[%s345_s24] sm:$0x7]  ;;  %409 = vmatpush.msra.mxu1 %v348_v6  ;;  %v351_v14 = vld [vmem:[%s868_s4 + $0x8] sm:$0xff]  ;;  %vm491_vm6 = vcmp.ge.s32.totalorder %v471_v41, 1  ;;  %vm492_vm8 = vcmp.lt.s32.totalorder %v471_v41, 4  ;;  %s666_s18 = sshll.u32 (%p793_p5), %s781_s27, 3 }
  0x23   : > { %v352_v9 = vld [vmem:[%s341_s14] sm:$0xff]  ;;  %661 = vmatpush.msk.msra.mxu2 %vm427_vm1, %v419_v8  ;;  %659 = vmatmul.msk.f32.vlgmr.msra.gmra.mxu1 %vm383_vm4, %v346_v10  ;;  %vm493_vm11 = vmand %vm491_vm6, %vm492_vm8  ;;  %s527_s13 = scalar_lea.vmem (%p793_p5), %s871_s7, %s666_s18 }
  0x24   : > { %375 = vmatpush.msra.mxu0 %v352_v9  ;;  %662 = vmatmul.msk.f32.vlgmr.msra.gmra.mxu2 %vm420_vm2, %v417_v5  ;;  %v456_v12 = vld [vmem:[%s870_s6] sm:$0xff] }
  0x25   : > { %656 = vmatmul.msk.f32.vlgmr.msra.gmra.mxu0 %vm353_vm3, %v350_v7  ;;  %670 = vmatpush.msra.mxu3 %v348_v6 }
  0x26   : > { %660 = vmatmul.msk.f32.vlgmr.msra.gmra.mxu3 %vm383_vm4, %v347_v11 }
  0x28   : > { %460 = vperm.xlu0 %696, %v456_v12  }
  0x2c   : > { %663 = vmatmul.msk.f32.gmra.mxu2 %vm420_vm2, %v418_v13 }
  0x2d   : > { %657 = vmatmul.msk.f32.gmra.mxu0 %vm353_vm3, %v351_v14 }
  0x92   : > { %v466_v15 = vpop.permute.xlu0 %465 }
  0x9a   : > { %v461_v20 = vpop.permute.xlu0 %460 }
  0xa0   : > { %v411_v17 = vpop.f32.mrf.mxu1 }
  0xa2   : > { %v377_v16 = vpop.f32.mrf.mxu0 }
  0xa3   : > { %v412_v18 = vadd.f32 %v411_v17, %v377_v16 }
  0xa7   : > { %v448_v19 = vpop.f32.mrf.mxu2 }
  0xa8   : > { %v454_v21 = vadd.f32 %v448_v19, %v412_v18 }
  0xa9   : > { %v414_v24 = vpop.f32.mrf.mxu3 }
  0xaa   : > { %v468_v22 = vadd.f32 %v461_v20, %v454_v21  ;;  %v380_v23 = vpop.f32.mrf.mxu0 }
  0xab   : > { %v415_v26 = vadd.f32 %v414_v24, %v380_v23 }
  0xac   : > { %v664_v25 = vmul.f32 -1.442695, %v468_v22 }
  0xae   : > { %697 = vpow2.f32 %v664_v25 }
  0xaf   : > { %v451_v27 = vpop.f32.mrf.mxu2 }
  0xb0   : > { %v455_v28 = vadd.f32 %v451_v27, %v415_v26 }
  0xb2   : > { %v469_v29 = vadd.f32 %v466_v15, %v455_v28 }
  0xb4   : > { %v698_v30 = vpop.eup %697  ;;  %v497_v31 = vmul.f32 %v469_v29, %v469_v29 }
  0xb5   : > { %v475_v32 = vadd.f32 1.0, %v698_v30 }
  0xb6   : > { %v498_v33 = vsel %vm390_vm0, %v497_v31, 0.0 }
  0xb7   : > { %699 = vrcp.f32 %v475_v32  ;;  %v499_v34 = vrot.slane %v498_v33, 4  ;;  %v487_v44 = vand.u32 2147483648, %v475_v32  ;;  %v485_v46 = vand.u32 2147483647, %v475_v32 }
  0xb8   : > { %vm481_vm7 = vweird.f32 %v475_v32 }
  0xb9   : > { %v500_v35 = vadd.f32 %v499_v34, %v498_v33  ;;  %v488_v50 = vor.u32 1.1754944e-38, %v487_v44  ;;  %vm486_vm10 = vcmp.eq.f32.partialorder %v485_v46, 8.507059e+37 }
  0xbb   : > { %v501_v37 = vrot.slane %v500_v35, 2 }
  0xbd   : > { %v700_v38 = vpop.eup %699  ;;  %v502_v40 = vadd.f32 %v501_v37, %v500_v35 }
  0xbe   : > { %v477_v39 = vmul.f32 %v700_v38, %v475_v32  ;;  %vm482_vm5 = vweird.f32 %v700_v38 }
  0xbf   : > { %v503_v43 = vrot.slane %v502_v40, 1  ;;  %vm483_vm9 = vmor %vm481_vm7, %vm482_vm5 }
  0xc0   : > { %v478_v42 = vsub.f32 1.0, %v477_v39 }
  0xc1   : > { %v504_v47 = vadd.f32 %v503_v43, %v502_v40 }
  0xc2   : > { %v479_v45 = vmul.f32 %v700_v38, %v478_v42 }
  0xc3   : > { %v505_v49 = vmax.f32 %v504_v47, 1e-24 }
  0xc4   : > { %v480_v48 = vadd.f32 %v700_v38, %v479_v45 }
  0xc5   : > { %701 = vrsqrt.f32 %v505_v49  ;;  %vm512_vm13 = vweird.f32 %v505_v49 }
  0xc6   : > { %v484_v51 = vsel %vm483_vm9, %v700_v38, %v480_v48 }
  0xc7   : > { %v489_v52 = vsel %vm486_vm10, %v488_v50, %v484_v51 }
  0xc8   : > { %v494_v53 = vmul.f32 0.5, %v489_v52 }
  0xca   : > { %v495_v54 = vsel %vm493_vm11, %v494_v53, %v489_v52 }
  0xcb   : > { %496 = vst [vmem:[%s337_s10] sm:$0xff] %v495_v54  ;;  %v702_v55 = vpop.eup %701 }
  0xcc   : > { %v507_v56 = vmul.f32 %v702_v55, %v505_v49  ;;  %vm513_vm12 = vweird.f32 %v702_v55 }
  0xcd   : > { %vm514_vm14 = vmor %vm512_vm13, %vm513_vm12 }
  0xce   : > { %v508_v57 = vmul.f32 %v702_v55, %v507_v56 }
  0xd0   : > { %v509_v58 = vmul.f32 0.5, %v508_v57 }
  0xd2   : > { %v510_v59 = vsub.f32 1.5, %v509_v58  ;;  %v558_v0 = vld [vmem:[%s337_s10] sm:$0xff] (%p793_p5) }
  0xd3   : > { %559 = vst [vmem:[%s527_s13] sm:$0xff] (%p793_p5), %v558_v0 }
  0xd4   : > { %v511_v60 = vmul.f32 %v702_v55, %v510_v59 }
  0xd6   : > { %v515_v61 = vsel %vm514_vm14, %v702_v55, %v511_v60  ;;  %525 = sbr.rel (!%p793_p5) target bundleno = 227 (0xe3), region = 90 }
  0xd7   : > { %v516_v62 = vsel %vm492_vm8, %v515_v61, 1.0 }
  0xd8   : > { %v517_v63 = vmul.f32 %v516_v62, %v469_v29 }
  0xda   : > { %518 = vst [vmem:[%s337_s10 + $0x8] sm:$0xff] %v517_v63 }
  0xe1   : > { %v560_v1 = vld [vmem:[%s337_s10 + $0x8] sm:$0xff] }
  0xe2   : > { %561 = vst [vmem:[%s527_s13 + $0x10] sm:$0xff] %v560_v1 }
  0xe3 PF: > { %p14_p11 = scmp.ge.s32.totalorder %s783_s28, 4   ;;  %s873_s24 = smov %s721_s25 }
  0xe4   : > { %s874_s25 = smov %s791_s8  ;;  %s875_s26 = smov %s783_s28 }
  0xe5   :  { %16 = sbr.rel (!%p14_p11) target bundleno = 2 (0x2), region = 165 }

</bundles_post_ra>
